<compile_context>
chip_gen: v7x
topology: tpu7x:2x2x1
jax: 0.10.0
libtpu: 0.0.40
codegen_flags: <defaults>
</compile_context>

<pallas_src>
import functools

import jax
import jax.numpy as jnp
from jax.experimental import pallas as pl
from jax.experimental.pallas import tpu as pltpu

EPS = 1e-5
MAX_TILE_HW = 16384          # lanes per tile (multiple of 128); sweep 8192..65536


def _stage1_fused_kernel(x_ref, wet_ref, be_ref, wdt_ref, bd_ref, out_ref):
    # x_ref   : (FC, T)       fold*C image channels on sublanes, pixels on lanes
    # wet_ref : (FClat, FC)   block-diagonal encode weight, transposed
    # be_ref  : (FClat, 1)    stacked encode bias (column)
    # wdt_ref : (FC, FClat)   block-diagonal decode weight (BN normalize/reverse folded in)
    # bd_ref  : (FC, 1)       stacked folded decode bias (column)
    x = x_ref[...]

    # encode: 1x1 conv over channels + ReLU (MXU + VPU), result (FClat, T)
    z = jnp.dot(wet_ref[...], x, preferred_element_type=jnp.float32) + be_ref[...]
    z = jnp.maximum(z, 0.0)

    # connector normalize + reverse folded into wdt/bd (mathematical identity)
    # decode: 1x1 conv back to image channels (MXU), lane-dense store
    out_ref[...] = (jnp.dot(wdt_ref[...], z, preferred_element_type=jnp.float32)
                    + bd_ref[...])


def _round_up(v, m):
    return ((v + m - 1) // m) * m


@functools.partial(jax.jit, static_argnames=("max_tile_hw",))
def stage1_model_wrapper_forward(x_nchw, params, *, max_tile_hw=MAX_TILE_HW):
    """Fused Stage1ModelWrapper.forward. x_nchw: (N, C, H, W) float32."""
    w_enc, b_enc, run_mean, run_var, w_dec, b_dec = params
    N, C, H, W = x_nchw.shape
    Clat = w_enc.shape[1]
    HW = H * W

    # ---- fold connector.normalize + connector.reverse into the decode weights ----
    var_eps = run_var + EPS                              # (1, Clat)
    scale = jnp.sqrt(var_eps) * jax.lax.rsqrt(var_eps)   # == 1 mathematically
    shift = run_mean * (1.0 - scale)                     # == 0 mathematically
    w_dec_fold = scale.reshape(Clat, 1) * w_dec          # (Clat, C)
    b_dec_fold = (shift @ w_dec + b_dec).reshape(C)      # (C,)

    # ---- fold `fold` images along the sublane (channel) axis so f32 (8,128) tiles fill ----
    fold = 1
    if C < 8:
        for cand in range(min(8 // C, N), 0, -1):
            if N % cand == 0:
                fold = cand
                break
    NG = N // fold
    FC = fold * C
    FClat = fold * Clat

    eye_f = jnp.eye(fold, dtype=jnp.float32)
    wet = jnp.kron(eye_f, jnp.transpose(w_enc))            # (FClat, FC) block-diag
    be_col = jnp.tile(b_enc.reshape(Clat, 1), (fold, 1))   # (FClat, 1)
    wdt = jnp.kron(eye_f, jnp.transpose(w_dec_fold))       # (FC, FClat) block-diag
    bd_col = jnp.tile(b_dec_fold.reshape(C, 1), (fold, 1)) # (FC, 1)
    # NOTE: encode-bias fusion via a ones row is skipped on purpose: it would push
    # FC from 8 to 9 sublanes and break the exact (8,128) tile fit.

    # ---- lane-dense tiling of the pixel axis (no pad, no slice) ----
    n_hw_tiles = pl.cdiv(HW, max_tile_hw)
    tile_hw = _round_up(pl.cdiv(HW, n_hw_tiles), 128)      # ragged last tile is masked

    x3 = x_nchw.reshape(NG, FC, HW)                        # free row-major view

    grid = (NG, n_hw_tiles)

    out3 = pl.pallas_call(
        _stage1_fused_kernel,
        out_shape=jax.ShapeDtypeStruct((NG, FC, HW), jnp.float32),
        grid_spec=pltpu.PrefetchScalarGridSpec(
            num_scalar_prefetch=0,
            grid=grid,
            in_specs=[
                pl.BlockSpec((None, FC, tile_hw), lambda n, h: (n, 0, h)),  # x tile
                pl.BlockSpec((FClat, FC),         lambda n, h: (0, 0)),     # W_enc^T (bd)
                pl.BlockSpec((FClat, 1),          lambda n, h: (0, 0)),     # b_enc col
                pl.BlockSpec((FC, FClat),         lambda n, h: (0, 0)),     # W_dec'^T (bd)
                pl.BlockSpec((FC, 1),             lambda n, h: (0, 0)),     # b_dec' col
            ],
            out_specs=pl.BlockSpec((None, FC, tile_hw), lambda n, h: (n, 0, h)),
        ),
        compiler_params=pltpu.CompilerParams(
            dimension_semantics=("parallel", "parallel")),
    )(x3, wet, be_col, wdt, bd_col)

    return out3.reshape(N, C, H, W)                        # free view, no transpose


def _reference_forward(x_nchw, params):
    """Pure-JAX reference of the original (unfolded) forward semantics."""
    w_enc, b_enc, run_mean, run_var, w_dec, b_dec = params
    N, C, H, W = x_nchw.shape
    x_rows = jnp.transpose(x_nchw, (0, 2, 3, 1)).reshape(-1, C)
    z = jnp.maximum(x_rows @ w_enc + b_enc, 0.0)
    z_norm = (z - run_mean) / jnp.sqrt(run_var + EPS)
    z_rev = z_norm * jnp.sqrt(run_var + EPS) + run_mean
    out = z_rev @ w_dec + b_dec
    return jnp.transpose(out.reshape(N, H, W, C), (0, 3, 1, 2))


def init_params(key, c_in, c_lat):
    k1, k2, k3, k4, k5, k6 = jax.random.split(key, 6)
    w_enc = jax.random.normal(k1, (c_in, c_lat), jnp.float32) * 0.1
    b_enc = jax.random.normal(k2, (1, c_lat), jnp.float32) * 0.01
    run_mean = jax.random.normal(k3, (1, c_lat), jnp.float32) * 0.05
    run_var = jax.nn.softplus(jax.random.normal(k4, (1, c_lat), jnp.float32)) + 0.5
    w_dec = jax.random.normal(k5, (c_lat, c_in), jnp.float32) * 0.1
    b_dec = jax.random.normal(k6, (1, c_in), jnp.float32) * 0.01
    return (w_enc, b_enc, run_mean, run_var, w_dec, b_dec)


if __name__ == "__main__":
    key = jax.random.PRNGKey(0)
    kx, kp = jax.random.split(key)

    N, C, H, W = 2, 4, 16, 16      # small NCHW image batch
    C_LAT = 32                     # latent channel dim

    x = jax.random.normal(kx, (N, C, H, W), jnp.float32)
    params = init_params(kp, C, C_LAT)

    out = stage1_model_wrapper_forward(x, params)
    out = jax.block_until_ready(out)

    ref = _reference_forward(x, params)
    assert out.shape == (N, C, H, W)
    assert jnp.allclose(out, ref, atol=1e-4, rtol=1e-4), float(
        jnp.max(jnp.abs(out - ref)))

    print("KERNEL_OK")
</pallas_src>

<mosaic_0001>
module attributes {stable_mosaic.version = 11 : i64} {
  func.func @_stage1_fused_kernel(%arg0: i32, %arg1: i32, %arg2: memref<1x8x256xf32, #tpu.memory_space<vmem>>, %arg3: memref<64x8xf32, #tpu.memory_space<vmem>>, %arg4: memref<64x1xf32, #tpu.memory_space<vmem>>, %arg5: memref<8x64xf32, #tpu.memory_space<vmem>>, %arg6: memref<8x1xf32, #tpu.memory_space<vmem>>, %arg7: memref<1x8x256xf32, #tpu.memory_space<vmem>>) attributes {dimension_semantics = [#tpu.dimension_semantics<parallel>, #tpu.dimension_semantics<parallel>], iteration_bounds = array<i64: 1, 1>, scalar_prefetch = 0 : i64, scratch_operands = 0 : i64, tpu.core_type = #tpu.core_type<tc>, window_params = [{transform_indices = @transform_0, window_bounds = array<i64: 1, 8, 256>}, {pipeline_mode = #tpu.pipeline_mode<synchronous>, transform_indices = @transform_1, window_bounds = array<i64: 64, 8>}, {pipeline_mode = #tpu.pipeline_mode<synchronous>, transform_indices = @transform_2, window_bounds = array<i64: 64, 1>}, {pipeline_mode = #tpu.pipeline_mode<synchronous>, transform_indices = @transform_3, window_bounds = array<i64: 8, 64>}, {pipeline_mode = #tpu.pipeline_mode<synchronous>, transform_indices = @transform_4, window_bounds = array<i64: 8, 1>}, {transform_indices = @transform_5, window_bounds = array<i64: 1, 8, 256>}]} {
    %c0 = arith.constant 0 : index
    %c0_0 = arith.constant 0 : index
    %c0_1 = arith.constant 0 : index
    %0 = vector.load %arg2[%c0, %c0_0, %c0_1] : memref<1x8x256xf32, #tpu.memory_space<vmem>>, vector<1x8x256xf32>
    %1 = vector.shape_cast %0 : vector<1x8x256xf32> to vector<8x256xf32>
    %c0_2 = arith.constant 0 : index
    %c0_3 = arith.constant 0 : index
    %2 = vector.load %arg3[%c0_2, %c0_3] : memref<64x8xf32, #tpu.memory_space<vmem>>, vector<64x8xf32>
    %cst = arith.constant dense<0.000000e+00> : vector<64x256xf32>
    %3 = tpu.matmul %2, %1, %cst {dimension_numbers = #tpu.dot_dimension_numbers<[1], [0], [0], [1], [0, 0, 1, 1], [], []>} : vector<64x8xf32>, vector<8x256xf32>, vector<64x256xf32> -> vector<64x256xf32>
    %c0_4 = arith.constant 0 : index
    %c0_5 = arith.constant 0 : index
    %4 = vector.load %arg4[%c0_4, %c0_5] : memref<64x1xf32, #tpu.memory_space<vmem>>, vector<64x1xf32>
    %5 = vector.broadcast %4 : vector<64x1xf32> to vector<64x256xf32>
    %6 = arith.addf %3, %5 : vector<64x256xf32>
    %cst_6 = arith.constant 0.000000e+00 : f32
    %7 = vector.broadcast %cst_6 : f32 to vector<64x256xf32>
    %8 = arith.maximumf %6, %7 : vector<64x256xf32>
    %c0_7 = arith.constant 0 : index
    %c0_8 = arith.constant 0 : index
    %9 = vector.load %arg5[%c0_7, %c0_8] : memref<8x64xf32, #tpu.memory_space<vmem>>, vector<8x64xf32>
    %cst_9 = arith.constant dense<0.000000e+00> : vector<8x256xf32>
    %10 = tpu.matmul %9, %8, %cst_9 {dimension_numbers = #tpu.dot_dimension_numbers<[1], [0], [0], [1], [0, 0, 1, 1], [], []>} : vector<8x64xf32>, vector<64x256xf32>, vector<8x256xf32> -> vector<8x256xf32>
    %c0_10 = arith.constant 0 : index
    %c0_11 = arith.constant 0 : index
    %11 = vector.load %arg6[%c0_10, %c0_11] : memref<8x1xf32, #tpu.memory_space<vmem>>, vector<8x1xf32>
    %12 = vector.broadcast %11 : vector<8x1xf32> to vector<8x256xf32>
    %13 = arith.addf %10, %12 : vector<8x256xf32>
    %c0_12 = arith.constant 0 : index
    %c0_13 = arith.constant 0 : index
    %c0_14 = arith.constant 0 : index
    %14 = vector.load %arg7[%c0_12, %c0_13, %c0_14] : memref<1x8x256xf32, #tpu.memory_space<vmem>>, vector<1x8x256xf32>
    %15 = vector.shape_cast %14 : vector<1x8x256xf32> to vector<8x256xf32>
    %16 = vector.shape_cast %13 : vector<8x256xf32> to vector<1x8x256xf32>
    tpu.vector_store %arg7[%c0_12, %c0_13, %c0_14], %16 {strides = array<i32>} : memref<1x8x256xf32, #tpu.memory_space<vmem>>, vector<1x8x256xf32>,
    return
  }
  func.func @transform_0(%arg0: i32, %arg1: i32) -> (i32, i32, i32) {
    %c0_i32 = arith.constant 0 : i32
    %c0_i32_0 = arith.constant 0 : i32
    return %arg0, %c0_i32, %arg1 : i32, i32, i32
  }
  func.func @transform_1(%arg0: i32, %arg1: i32) -> (i32, i32) {
    %c0_i32 = arith.constant 0 : i32
    %c0_i32_0 = arith.constant 0 : i32
    %c0_i32_1 = arith.constant 0 : i32
    return %c0_i32, %c0_i32_0 : i32, i32
  }
  func.func @transform_2(%arg0: i32, %arg1: i32) -> (i32, i32) {
    %c0_i32 = arith.constant 0 : i32
    %c0_i32_0 = arith.constant 0 : i32
    %c0_i32_1 = arith.constant 0 : i32
    return %c0_i32, %c0_i32_0 : i32, i32
  }
  func.func @transform_3(%arg0: i32, %arg1: i32) -> (i32, i32) {
    %c0_i32 = arith.constant 0 : i32
    %c0_i32_0 = arith.constant 0 : i32
    %c0_i32_1 = arith.constant 0 : i32
    return %c0_i32, %c0_i32_0 : i32, i32
  }
  func.func @transform_4(%arg0: i32, %arg1: i32) -> (i32, i32) {
    %c0_i32 = arith.constant 0 : i32
    %c0_i32_0 = arith.constant 0 : i32
    %c0_i32_1 = arith.constant 0 : i32
    return %c0_i32, %c0_i32_0 : i32, i32
  }
  func.func @transform_5(%arg0: i32, %arg1: i32) -> (i32, i32, i32) {
    %c0_i32 = arith.constant 0 : i32
    %c0_i32_0 = arith.constant 0 : i32
    return %arg0, %c0_i32, %arg1 : i32, i32, i32
  }
}

</mosaic_0001>

<bundles_post_ra>
// kernel: stage1_model_wrapper_forward.1
= control target key start
LH: loop header
LB: loop body
LE: loop exit
PB: predicated region body
PF: predicated region fallthrough
CT: control target
= control target key end

     0   :  { %v349_v2 = vmov 0.0   ;;  %vm78_vm0 = vcmask 64512   ;;  %v350_v4 = vmov 0   ;;  %vm239_vm1 = vcmask 523264   ;;  %s455_s0 = inlined_call_operand.vmem [shape: f32[1,8,256], index: 0, kind: input, shape index: {}]   ;;  %s456_s1 = inlined_call_operand.vmem [shape: f32[64,8], index: 1, kind: input, shape index: {}]   ;;  %s457_s2 = inlined_call_operand.vmem [shape: f32[64,1], index: 2, kind: input, shape index: {}]   ;;  %s458_s4 = inlined_call_operand.vmem [shape: f32[8,1], index: 4, kind: input, shape index: {}]   ;;  %s459_s3 = inlined_call_operand.vmem [shape: f32[8,64], index: 3, kind: input, shape index: {}]   ;;  %s460_s5 = inlined_call_operand.vmem [shape: f32[1,8,256], index: 5, kind: output, shape index: {}]  }
   0x1   :  { %v21_v0 = vld [vmem:[%s455_s0 + $0x8] sm:$0xff]  ;;  %v20_v1 = vld [vmem:[%s455_s0] sm:$0xff]  ;;  %167 = vmatprep.mubr.f32.mxu0 %v349_v2  ;;  %347 = vset.pattern.permute.xlu0 %v350_v4  ;;  %v32_v7 = vld [vmem:[%s457_s2 + $0x10] sm:$0xff] }
   0x2   :  { %v22_v3 = vld [vmem:[%s456_s1] sm:$0xff]  ;;  %103 = vmatprep.subr.mxu0 %v21_v0  ;;  %348 = vset.pattern.permute.xlu1 %v350_v4  ;;  %v23_v6 = vld [vmem:[%s456_s1 + $0x8] sm:$0xff]  ;;  %v33_v9 = vld [vmem:[%s457_s2 + $0x18] sm:$0xff] }
   0x3   :  { %104 = vmatpush1.msra.mxu0 %v20_v1  ;;  %307 = vmatprep.mubr.f32.mxu1 %v349_v2  ;;  %v30_v5 = vld [vmem:[%s457_s2] sm:$0xff]  ;;  %v31_v8 = vld [vmem:[%s457_s2 + $0x8] sm:$0xff]  ;;  %v24_v10 = vld [vmem:[%s456_s1 + $0x10] sm:$0xff] }
   0x4   :  { %320 = vmatmul.mubr.msk.f32.vlgmr.msra.gmra.mrb[0].mxu0 %vm78_vm0, %v22_v3  ;;  %40 = vperm.xlu0 %347, %v30_v5   ;;  %v34_v11 = vld [vmem:[%s457_s2 + $0x20] sm:$0xff]  ;;  %v35_v12 = vld [vmem:[%s457_s2 + $0x28] sm:$0xff]  ;;  %v25_v13 = vld [vmem:[%s456_s1 + $0x18] sm:$0xff] }
   0x5   :  { %173 = vmatprep.mubr.f32.mxu0 %v349_v2  ;;  %50 = vperm.xlu1 %348, %v32_v7   ;;  %v36_v14 = vld [vmem:[%s457_s2 + $0x30] sm:$0xff]  ;;  %v37_v15 = vld [vmem:[%s457_s2 + $0x38] sm:$0xff]  ;;  %v26_v16 = vld [vmem:[%s456_s1 + $0x20] sm:$0xff] }
   0x6   :  { %v233_v17 = vld [vmem:[%s458_s4] sm:$0xff]  ;;  %v27_v18 = vld [vmem:[%s456_s1 + $0x28] sm:$0xff]  ;;  %v28_v19 = vld [vmem:[%s456_s1 + $0x30] sm:$0xff] }
   0x7   :  { %v29_v20 = vld [vmem:[%s456_s1 + $0x38] sm:$0xff] }
   0x8   :  { %321 = vmatmul.mubr.msk.f32.gmra.mrb[2].mxu0 %vm78_vm0, %v23_v6  ;;  %45 = vperm.xlu0 %347, %v31_v8  }
   0x9   :  { %179 = vmatprep.mubr.f32.mxu0 %v349_v2  ;;  %55 = vperm.xlu1 %348, %v33_v9  }
   0xc   :  { %322 = vmatmul.mubr.msk.f32.gmra.mrb[4].mxu0 %vm78_vm0, %v24_v10  ;;  %60 = vperm.xlu0 %347, %v34_v11  }
   0xd   :  { %185 = vmatprep.mubr.f32.mxu0 %v349_v2  ;;  %65 = vperm.xlu1 %348, %v35_v12  }
  0x10   :  { %323 = vmatmul.mubr.msk.f32.gmra.mrb[6].mxu0 %vm78_vm0, %v25_v13  ;;  %70 = vperm.xlu0 %347, %v36_v14  }
  0x11   :  { %191 = vmatprep.mubr.f32.mxu0 %v349_v2  ;;  %75 = vperm.xlu1 %348, %v37_v15  }
  0x14   :  { %324 = vmatmul.mubr.msk.f32.gmra.mrb[8].mxu0 %vm78_vm0, %v26_v16  ;;  %236 = vperm.xlu0 %347, %v233_v17  }
  0x15   :  { %197 = vmatprep.mubr.f32.mxu0 %v349_v2 }
  0x18   :  { %325 = vmatmul.mubr.msk.f32.gmra.mrb[10].mxu0 %vm78_vm0, %v27_v18 }
  0x19   :  { %203 = vmatprep.mubr.f32.mxu0 %v349_v2 }
  0x1c   :  { %326 = vmatmul.mubr.msk.f32.gmra.mrb[12].mxu0 %vm78_vm0, %v28_v19 }
  0x1d   :  { %209 = vmatprep.mubr.f32.mxu0 %v349_v2 }
  0x20   :  { %327 = vmatmul.mubr.msk.f32.gmra.mrb[14].mxu0 %vm78_vm0, %v29_v20 }
  0x83   :  { %v41_v21 = vpop.permute.xlu0 %40 }
  0x84   :  { %v51_v30 = vpop.permute.xlu1 %50 }
  0x87   :  { %v46_v25 = vpop.permute.xlu0 %45 }
  0x88   :  { %v56_v41 = vpop.permute.xlu1 %55 }
  0x8b   :  { %v61_v54 = vpop.permute.xlu0 %60 }
  0x8c   :  { %v66_v57 = vpop.permute.xlu1 %65 }
  0x8f   :  { %v71_v6 = vpop.permute.xlu0 %70 }
  0x90   :  { %v76_v9 = vpop.permute.xlu1 %75 }
  0xd7   :  { %v169_v22 = vpop.f32.mrb[0].mxu0 }
  0xd8   :  { %v171_v23 = vpop.f32.mrb[1].mxu0  ;;  %v170_v24 = vadd.f32 %v169_v22, %v41_v21  ;;  %v237_v22 = vpop.permute.xlu0 %236 }
  0xd9   :  { %v172_v26 = vadd.f32 %v171_v23, %v41_v21  ;;  %v232_v21 = vld [vmem:[%s459_s3] sm:$0xff] }
  0xda   :  { %v216_v32 = vmax.f32 %v170_v24, 0.0 }
  0xdb   :  { %v175_v27 = vpop.f32.mrb[2].mxu0  ;;  %v217_v34 = vmax.f32 %v172_v26, 0.0 }
  0xdc   :  { %v176_v28 = vadd.f32 %v175_v27, %v46_v25  ;;  %v177_v29 = vpop.f32.mrb[3].mxu0 }
  0xdd   :  { %v178_v31 = vadd.f32 %v177_v29, %v46_v25 }
  0xde   :  { %v218_v33 = vmax.f32 %v176_v28, 0.0 }
  0xdf   :  { %v219_v35 = vmax.f32 %v178_v31, 0.0  ;;  %v181_v36 = vpop.f32.mrb[4].mxu0 }
  0xe0   :  { %v183_v37 = vpop.f32.mrb[5].mxu0  ;;  %v331_v38 = vpack.c.bf16 %v218_v33, %v216_v32  ;;  %v182_v40 = vadd.f32 %v181_v36, %v51_v30 }
  0xe1   :  { %v329_v39 = vpack.c.bf16 %v219_v35, %v217_v34  ;;  %v184_v42 = vadd.f32 %v183_v37, %v51_v30 }
  0xe2   :  { %v220_v47 = vmax.f32 %v182_v40, 0.0 }
  0xe3   :  { %v187_v43 = vpop.f32.mrb[6].mxu0  ;;  %330 = vmatprep.subr.bf16.mxu1 %v329_v39  ;;  %v221_v49 = vmax.f32 %v184_v42, 0.0 }
  0xe4   :  { %v188_v44 = vadd.f32 %v187_v43, %v56_v41  ;;  %v189_v45 = vpop.f32.mrb[7].mxu0  ;;  %332 = vmatpush1.bf16.msra.mxu1 %v331_v38 }
  0xe5   :  { %v190_v46 = vadd.f32 %v189_v45, %v56_v41 }
  0xe6   :  { %v222_v48 = vmax.f32 %v188_v44, 0.0 }
  0xe7   :  { %v223_v50 = vmax.f32 %v190_v46, 0.0  ;;  %v193_v51 = vpop.f32.mrb[8].mxu0 }
  0xe8   :  { %v335_v52 = vpack.c.bf16 %v222_v48, %v220_v47  ;;  %v195_v53 = vpop.f32.mrb[9].mxu0  ;;  %v194_v56 = vadd.f32 %v193_v51, %v61_v54 }
  0xe9   :  { %v333_v55 = vpack.c.bf16 %v223_v50, %v221_v49  ;;  %v196_v58 = vadd.f32 %v195_v53, %v61_v54 }
  0xea   :  { %v224_v63 = vmax.f32 %v194_v56, 0.0 }
  0xeb   :  { %v199_v59 = vpop.f32.mrb[10].mxu0  ;;  %334 = vmatprep.subr.bf16.mxu1 %v333_v55  ;;  %v225_v1 = vmax.f32 %v196_v58, 0.0 }
  0xec   :  { %v200_v60 = vadd.f32 %v199_v59, %v66_v57  ;;  %v201_v61 = vpop.f32.mrb[11].mxu0  ;;  %336 = vmatpush1.bf16.msra.mxu1 %v335_v52 }
  0xed   :  { %v202_v62 = vadd.f32 %v201_v61, %v66_v57 }
  0xee   :  { %v226_v0 = vmax.f32 %v200_v60, 0.0 }
  0xef   :  { %v227_v2 = vmax.f32 %v202_v62, 0.0  ;;  %v205_v3 = vpop.f32.mrb[12].mxu0 }
  0xf0   :  { %v339_v4 = vpack.c.bf16 %v226_v0, %v224_v63  ;;  %v207_v5 = vpop.f32.mrb[13].mxu0  ;;  %v206_v8 = vadd.f32 %v205_v3, %v71_v6 }
  0xf1   :  { %v337_v7 = vpack.c.bf16 %v227_v2, %v225_v1  ;;  %v208_v10 = vadd.f32 %v207_v5, %v71_v6 }
  0xf2   :  { %v228_v15 = vmax.f32 %v206_v8, 0.0 }
  0xf3   :  { %v211_v11 = vpop.f32.mrb[14].mxu0  ;;  %338 = vmatprep.subr.bf16.mxu1 %v337_v7  ;;  %v229_v17 = vmax.f32 %v208_v10, 0.0 }
  0xf4   :  { %v212_v12 = vadd.f32 %v211_v11, %v76_v9  ;;  %v213_v13 = vpop.f32.mrb[15].mxu0  ;;  %340 = vmatpush1.bf16.msra.mxu1 %v339_v4 }
  0xf5   :  { %v214_v14 = vadd.f32 %v213_v13, %v76_v9 }
  0xf6   :  { %v230_v16 = vmax.f32 %v212_v12, 0.0 }
  0xf7   :  { %v231_v18 = vmax.f32 %v214_v14, 0.0 }
  0xf8   :  { %v343_v19 = vpack.c.bf16 %v230_v16, %v228_v15 }
  0xf9   :  { %v341_v20 = vpack.c.bf16 %v231_v18, %v229_v17 }
  0xfb   :  { %342 = vmatprep.subr.bf16.mxu1 %v341_v20 }
  0xfc   :  { %344 = vmatpush1.bf16.msra.mxu1 %v343_v19 }
  0xff   :  { %328 = vmatmul.mubr.msk.f32.vlgmr.msra.gmra.mrb[0].mxu1 %vm239_vm1, %v232_v21 }
 0x1d2   :  { %v309_v23 = vpop.f32.mrb[0].mxu1 }
 0x1d3   :  { %v310_v24 = vadd.f32 %v309_v23, %v237_v22  ;;  %v311_v25 = vpop.f32.mrb[1].mxu1 }
 0x1d4   :  { %v312_v26 = vadd.f32 %v311_v25, %v237_v22 }
 0x1d5   :  { %314 = vst [vmem:[%s460_s5] sm:$0xff] %v310_v24 }
 0x1d6   :  { %315 = vst [vmem:[%s460_s5 + $0x8] sm:$0xff] %v312_v26 }

</bundles_post_ra>
